<compile_context>
chip_gen: v5e
topology: v5e:2x2
jax: 0.10.0
libtpu: 0.0.40
codegen_flags: <defaults>
</compile_context>

<pallas_src>
import jax
import jax.numpy as jnp
from jax.experimental import pallas as pl
from jax.experimental.pallas import tpu as pltpu


def _dice_partial_kernel(x_ref, t_ref, o_ref):
    """Accumulate per-class [intersect, y_sum, z_sum] over spatial chunks.

    x_ref, t_ref: (1, C, CHUNK) blocks.
    o_ref:        (1, 3, C) accumulator, resident across the chunk grid axis.
    """
    j = pl.program_id(1)  # spatial-chunk (reduction) axis

    @pl.when(j == 0)
    def _():
        o_ref[...] = jnp.zeros_like(o_ref)

    s = x_ref[...].astype(jnp.float32)          # (1, C, CHUNK)
    t = t_ref[...].astype(jnp.float32)          # (1, C, CHUNK)

    intersect = jnp.sum(s * t, axis=-1)         # (1, C)
    y_sum = jnp.sum(t * t, axis=-1)             # (1, C)
    z_sum = jnp.sum(s * s, axis=-1)             # (1, C)

    # (3, C) -> (1, 3, C), accumulate into the resident output block.
    o_ref[...] += jnp.concatenate([intersect, y_sum, z_sum], axis=0)[None]


def _round_up(x, m):
    return ((x + m - 1) // m) * m


def _choose_chunk(hw_pad, n_classes, bytes_per_elem, max_block_bytes=2 << 20):
    """Largest multiple of 128 that divides hw_pad, capped so one input block
    stays around ~2 MiB (safe for v5e default scoped VMEM and v7x's 64 MiB)."""
    max_lanes = (max_block_bytes // max(1, n_classes * bytes_per_elem)) // 128 * 128
    max_lanes = max(128, min(max_lanes, hw_pad, 2048))
    chunk = 128
    cand = 128
    while cand <= max_lanes:
        if hw_pad % cand == 0:
            chunk = cand
        cand += 128
    return chunk


def soft_dice_loss(inputs, target):
    """inputs, target: (B, C, H, W). Returns scalar mean dice loss (float32)."""
    assert inputs.shape == target.shape, "predict & target shape do not match"
    B, C, H, W = inputs.shape
    HW = H * W

    # Free, no-copy reshape (contiguous trailing dims merged) -- no transpose.
    x = inputs.reshape(B, C, HW)
    t = target.reshape(B, C, HW)

    # Pad the spatial dim up to a multiple of 128 if needed (zeros contribute
    # nothing to intersect / y_sum / z_sum, so this is exact).
    HW_pad = _round_up(HW, 128)
    if HW_pad != HW:
        pad = HW_pad - HW
        x = jnp.pad(x, ((0, 0), (0, 0), (0, pad)))
        t = jnp.pad(t, ((0, 0), (0, 0), (0, pad)))

    bpe = max(jnp.dtype(x.dtype).itemsize, jnp.dtype(t.dtype).itemsize)
    chunk = _choose_chunk(HW_pad, C, bpe)
    n_chunks = HW_pad // chunk

    block = (1, C, chunk)
    partials = pl.pallas_call(
        _dice_partial_kernel,
        out_shape=jax.ShapeDtypeStruct((B, 3, C), jnp.float32),
        grid_spec=pltpu.PrefetchScalarGridSpec(
            num_scalar_prefetch=0,
            grid=(B, n_chunks),
            in_specs=[
                pl.BlockSpec(block, lambda b, j: (b, 0, j)),
                pl.BlockSpec(block, lambda b, j: (b, 0, j)),
            ],
            out_specs=pl.BlockSpec((1, 3, C), lambda b, j: (b, 0, 0)),
        ),
        compiler_params=pltpu.CompilerParams(
            dimension_semantics=("parallel", "arbitrary"),
        ),
    )(x, t)

    # Epilogue in plain JAX: reduce over batch, per-class dice, mean.
    sums = jnp.sum(partials, axis=0)            # (3, C)
    intersect, y_sum, z_sum = sums[0], sums[1], sums[2]
    smooth = jnp.float32(1e-10)
    class_dice_loss = 1.0 - (2.0 * intersect + smooth) / (z_sum + y_sum + smooth)
    # TODO(synk): the PyTorch forward builds class_wise_dice (= 1 - dice per
    # class via .item()) but does not return it; it is `1.0 - class_dice_loss`
    # here if ever needed.
    return jnp.mean(class_dice_loss)


def _reference(inputs, target):
    # Pure-JAX mirror of the PyTorch module for verification.
    B, C, H, W = inputs.shape
    smooth = 1e-10
    loss = 0.0
    for i in range(C):
        s = inputs[:, i].astype(jnp.float32)
        t = target[:, i].astype(jnp.float32)
        intersect = jnp.sum(s * t)
        y_sum = jnp.sum(t * t)
        z_sum = jnp.sum(s * s)
        loss += 1.0 - (2 * intersect + smooth) / (z_sum + y_sum + smooth)
    return loss / C


if __name__ == "__main__":
    key = jax.random.PRNGKey(0)
    k1, k2 = jax.random.split(key)
    B, C, H, W = 2, 4, 16, 16
    # "inputs" ~ softmax-like probabilities, "target" ~ one-hot labels.
    logits = jax.random.normal(k1, (B, C, H, W), dtype=jnp.float32)
    inputs = jax.nn.softmax(logits, axis=1)
    labels = jax.random.randint(k2, (B, H, W), 0, C)
    target = jax.nn.one_hot(labels, C, axis=1, dtype=jnp.float32)

    loss = jax.block_until_ready(soft_dice_loss(inputs, target))
    ref = jax.block_until_ready(_reference(inputs, target))
    assert jnp.allclose(loss, ref, rtol=1e-5, atol=1e-6), (loss, ref)
    print("KERNEL_OK")
</pallas_src>

<mosaic_0001>
module attributes {stable_mosaic.version = 11 : i64} {
  func.func @_dice_partial_kernel(%arg0: i32, %arg1: i32, %arg2: memref<1x4x256xf32, #tpu.memory_space<vmem>>, %arg3: memref<1x4x256xf32, #tpu.memory_space<vmem>>, %arg4: memref<1x3x4xf32, #tpu.memory_space<vmem>>) attributes {dimension_semantics = [#tpu.dimension_semantics<parallel>, #tpu.dimension_semantics<arbitrary>], iteration_bounds = array<i64: 2, 1>, scalar_prefetch = 0 : i64, scratch_operands = 0 : i64, tpu.core_type = #tpu.core_type<tc>, window_params = [{transform_indices = @transform_0, window_bounds = array<i64: 1, 4, 256>}, {transform_indices = @transform_1, window_bounds = array<i64: 1, 4, 256>}, {transform_indices = @transform_2, window_bounds = array<i64: 1, 3, 4>}]} {
    %c0_i32 = arith.constant 0 : i32
    %0 = arith.cmpi eq, %arg1, %c0_i32 : i32
    %1 = arith.extui %0 : i1 to i32
    %c0_i32_0 = arith.constant 0 : i32
    %2 = arith.cmpi ne, %1, %c0_i32_0 : i32
    scf.if %2 {
      %cst_14 = arith.constant 0.000000e+00 : f32
      %16 = vector.broadcast %cst_14 : f32 to vector<1x3x4xf32>
      %c0_15 = arith.constant 0 : index
      %c0_16 = arith.constant 0 : index
      %c0_17 = arith.constant 0 : index
      %17 = vector.load %arg4[%c0_15, %c0_16, %c0_17] : memref<1x3x4xf32, #tpu.memory_space<vmem>>, vector<1x3x4xf32>
      tpu.vector_store %arg4[%c0_15, %c0_16, %c0_17], %16 {strides = array<i32>} : memref<1x3x4xf32, #tpu.memory_space<vmem>>, vector<1x3x4xf32>,
    } else {
    }
    %c0 = arith.constant 0 : index
    %c0_1 = arith.constant 0 : index
    %c0_2 = arith.constant 0 : index
    %3 = vector.load %arg2[%c0, %c0_1, %c0_2] : memref<1x4x256xf32, #tpu.memory_space<vmem>>, vector<1x4x256xf32>
    %c0_3 = arith.constant 0 : index
    %c0_4 = arith.constant 0 : index
    %c0_5 = arith.constant 0 : index
    %4 = vector.load %arg3[%c0_3, %c0_4, %c0_5] : memref<1x4x256xf32, #tpu.memory_space<vmem>>, vector<1x4x256xf32>
    %5 = arith.mulf %3, %4 : vector<1x4x256xf32>
    %cst = arith.constant dense<0.000000e+00> : vector<1x4xf32>
    %6 = vector.multi_reduction <add>, %5, %cst [2] : vector<1x4x256xf32> to vector<1x4xf32>
    %7 = arith.mulf %4, %4 : vector<1x4x256xf32>
    %cst_6 = arith.constant dense<0.000000e+00> : vector<1x4xf32>
    %8 = vector.multi_reduction <add>, %7, %cst_6 [2] : vector<1x4x256xf32> to vector<1x4xf32>
    %9 = arith.mulf %3, %3 : vector<1x4x256xf32>
    %cst_7 = arith.constant dense<0.000000e+00> : vector<1x4xf32>
    %10 = vector.multi_reduction <add>, %9, %cst_7 [2] : vector<1x4x256xf32> to vector<1x4xf32>
    %c0_8 = arith.constant 0 : index
    %c0_9 = arith.constant 0 : index
    %c0_10 = arith.constant 0 : index
    %11 = vector.load %arg4[%c0_8, %c0_9, %c0_10] : memref<1x3x4xf32, #tpu.memory_space<vmem>>, vector<1x3x4xf32>
    %12 = tpu.concatenate %6, %8, %10 in 0 : vector<1x4xf32>, vector<1x4xf32>, vector<1x4xf32> -> vector<3x4xf32>
    %13 = vector.shape_cast %12 : vector<3x4xf32> to vector<1x3x4xf32>
    %14 = arith.addf %11, %13 : vector<1x3x4xf32>
    %c0_11 = arith.constant 0 : index
    %c0_12 = arith.constant 0 : index
    %c0_13 = arith.constant 0 : index
    %15 = vector.load %arg4[%c0_11, %c0_12, %c0_13] : memref<1x3x4xf32, #tpu.memory_space<vmem>>, vector<1x3x4xf32>
    tpu.vector_store %arg4[%c0_11, %c0_12, %c0_13], %14 {strides = array<i32>} : memref<1x3x4xf32, #tpu.memory_space<vmem>>, vector<1x3x4xf32>,
    return
  }
  func.func @transform_0(%arg0: i32, %arg1: i32) -> (i32, i32, i32) {
    %c0_i32 = arith.constant 0 : i32
    %c0_i32_0 = arith.constant 0 : i32
    return %arg0, %c0_i32, %arg1 : i32, i32, i32
  }
  func.func @transform_1(%arg0: i32, %arg1: i32) -> (i32, i32, i32) {
    %c0_i32 = arith.constant 0 : i32
    %c0_i32_0 = arith.constant 0 : i32
    return %arg0, %c0_i32, %arg1 : i32, i32, i32
  }
  func.func @transform_2(%arg0: i32, %arg1: i32) -> (i32, i32, i32) {
    %c0_i32 = arith.constant 0 : i32
    %c0_i32_0 = arith.constant 0 : i32
    %c0_i32_1 = arith.constant 0 : i32
    return %arg0, %c0_i32, %c0_i32_0 : i32, i32, i32
  }
}

</mosaic_0001>

<bundles_post_ra>
// kernel: tpu_custom_call.1
= control target key start
LH: loop header
LB: loop body
LE: loop exit
PB: predicated region body
PF: predicated region fallthrough
CT: control target
= control target key end

     0   :  { %7 = vsyncpa [#allocation3], 0  ;;  %s704_s0 = inlined_call_operand.hbm [shape: f32[2,4,256], index: 0, kind: input, shape index: {}]   ;;  %s705_s1 = inlined_call_operand.hbm [shape: f32[2,4,256], index: 1, kind: input, shape index: {}]   ;;  %s706_s2 = inlined_call_operand.vmem [shape: f32[2,3,4], index: 2, kind: output, shape index: {}]  }
   0x1   :  { %9 = vsyncpa [#allocation3 + $0x1], 0 }
   0x2   :  { %10 = vsyncpa [#allocation5], 0 }
   0x3   :  { %12 = vsyncpa [#allocation5 + $0x1], 0  ;;  %s601_s9 = smov 0   ;;  %s603_s10 = smov 0  }
   0x4   :  { %s605_s11 = smov 0   ;;  %s607_s12 = smov 0  }
   0x5   :  { %s609_s13 = smov 0   ;;  %s611_s14 = smov 0  }
   0x6 LB: > { %s390_s15 = sadd.s32 4294967295, %s583_s14   ;;  %s30_s16 = sadd.s32 1, %s579_s13  ;;  %s583_s14 = sphi %s611_s14, %s18_s14   ;;  %s579_s13 = sphi %s609_s13, %s713_s13   ;;  %s575_s12 = sphi %s607_s12, %s712_s12   ;;  %s571_s11 = sphi %s605_s11, %s711_s11   ;;  %s567_s10 = sphi %s603_s10, %s710_s10   ;;  %s563_s9 = sphi %s601_s9, %s709_s9  }
   0x7   : > { %p32_p0 = scmp.ge.s32.totalorder %s30_s16, 2  ;;  %s39_s17 = sadd.s32 1, %s571_s11 }
   0x8   : > { %p46_p1 = scmp.ne.s32.totalorder %s571_s11, %s567_s10  ;;  %p47_p2 = scmp.eq.s32.totalorder %s583_s14, 0 }
   0x9   : > { %s715_s16 = smov (%p32_p0, %s30_s16), 0  ;;  %p52_p4 = scmp.ne.s32.totalorder %s567_s10, %s563_s9 }
   0xa   : > { %p637_p3 = por %p47_p2, %p46_p1  ;;  %s34_s19 = ssub.s32 %s579_s13, %s715_s16 }
   0xb   : > { %p53_p5 = scmp.eq.s32.totalorder %s390_s15, 0  ;;  %p37_p6 = scmp.eq.s32.totalorder %s34_s19, 0 }
   0xc   : > { %p419_p8 = scmp.lt.s32.totalorder %s583_s14, 2  ;;  %s130_s22 = sand.u32 1, %s571_s11  }
   0xd   : > { %p644_p7 = por %p53_p5, %p52_p4  ;;  %s406_s23 = sshll.u32 %s579_s13, 3 }
   0xe   : > { %s650_s21 = scalar_select %p37_p6, %s571_s11, %s39_s17  }
   0xf   : > { %s394_s24 = sshll.u32 %s130_s22, 3  ;;  %s141_s27 = scalar_lea.hbm %s704_s0, %s406_s23 }
  0x10   : > { %s143_s28 = sshll.u32 %s141_s27, 4  ;;  %s134_s29 = scalar_lea.vmem [#allocation2], %s394_s24  ;;  %s144_s28 = int_to_ptr.hbm [resolvable:$true] %s143_s28 }
  0x11   : > { %s145_s30 = sshll.u32 %s134_s29, 4  ;;  %p413_p9 = pnand %p419_p8, %p637_p3  ;;  %s146_s30 = int_to_ptr.vmem [resolvable:$true] %s145_s30 }
  0x12   : > { %p400_p10 = scmp.ge.s32.totalorder %s583_s14, 1  ;;  %p172_p11 = scmp.lt.s32.totalorder %s583_s14, 3 }
  0x13   : > { %s131_s3 = scalar_lea.sflag [#allocation3], %s130_s22  ;;  %s163_s6 = scalar_lea.hbm %s705_s1, %s406_s23 }
  0x14   : > { %415 = dma.hbm_to_vmem [thread:$0]  (!%p413_p9), %s144_s28, 128, %s146_s30, %s131_s3  }
  0x15   : > { %p173_p12 = pnand %p400_p10, %p172_p11  ;;  %s165_s7 = sshll.u32 %s163_s6, 4  ;;  %s166_s7 = int_to_ptr.hbm [resolvable:$true] %s165_s7 }
  0x16   : > { %s156_s8 = scalar_lea.vmem [#allocation4], %s394_s24  ;;  %s153_s15 = scalar_lea.sflag [#allocation5], %s130_s22 }
  0x17   : > { %s167_s9 = sshll.u32 %s156_s8, 4  ;;  %176 = sbr.rel (%p173_p12) target bundleno = 183 (0xb7), region = 28  ;;  %s168_s9 = int_to_ptr.vmem [resolvable:$true] %s167_s9 }
  0x18   : > { %418 = dma.hbm_to_vmem [thread:$0]  (!%p413_p9), %s166_s7, 128, %s168_s9, %s153_s15  }
  0x19   : > { %s178_s17 = sand.u32 (!%p173_p12), 1, %s567_s10  }
  0x1a   : > { %s401_s18 = sshll.u32 (!%p173_p12), %s178_s17, 3  ;;  %s179_s19 = scalar_lea.sflag (!%p173_p12), [#allocation3], %s178_s17 }
  0x1b   : > { %s182_s25 = scalar_lea.vmem (!%p173_p12), [#allocation2], %s401_s18 }
  0x1c   : > { %554 = dma.done.wait (%p644_p7), %s179_s19, 128  }
  0x1d   : > { %556 = vsyncadd (%p644_p7), %s179_s19, 4294967168  ;;  %s189_s23 = scalar_lea.sflag [#allocation5], %s178_s17  ;;  %s192_s24 = scalar_lea.vmem [#allocation4], %s401_s18 }
  0x1e   : > { %558 = dma.done.wait (%p644_p7), %s189_s23, 128  }
  0x1f   : > { %560 = vsyncadd (%p644_p7), %s189_s23, 4294967168  ;;  %v230_v0 = vld [vmem:[%s182_s25] sm:$0xff]  ;;  %v231_v1 = vld [vmem:[%s192_s24] sm:$0xff]  ;;  %vm239_vm0 = vcmask 1043456   ;;  %p220_p13 = scmp.lt.s32.totalorder %s575_s12, 1  ;;  %vm228_vm1 = vcmask 26624   ;;  %v271_v22 = vlaneseq }
  0x20   : > { %v232_v2 = vmul.f32 %v231_v1, %v230_v0  ;;  %v245_v3 = vmul.f32 %v231_v1, %v231_v1  ;;  %v257_v9 = vmul.f32 %v230_v0, %v230_v0  ;;  %v585_v20 = vmov 0.0  }
  0x21   : > { %s717_s12 = smov (!%p220_p13, %s575_s12), 1  ;;  %v272_v23 = vand.u32 127, %v271_v22  ;;  %vm281_vm2 = vcmask 1040384   ;;  %vm283_vm3 = vcmask 1041408  }
  0x22   : > { %234 = vst [vmem:[#allocation1] ss:$2 sm:$0xff] %v232_v2  ;;  %s403_s20 = sshll.u32 %s717_s12, 2 }
  0x23   : > { %s223_s27 = scalar_lea.vmem %s706_s2, %s403_s20 }
  0x24   : > { %229 = vst.msk [vmem:[%s223_s27] sm:$0x7] %vm228_vm1, %v585_v20 }
  0x29   : > { %v235_v4 = vld.sshfl [vmem:[#allocation1] sm:$0xff pattern:$0x75316420]  ;;  %v236_v5 = vld.sshfl [vmem:[#allocation1 + $0x8] sm:$0xff pattern:$0x75316420] }
  0x2a   : > { %v240_v6 = vsel %vm239_vm0, %v235_v4, 0.0  ;;  %v241_v7 = vsel %vm239_vm0, %v236_v5, 0.0  ;;  %247 = vst [vmem:[#allocation1] ss:$2 sm:$0xff] %v245_v3 }
  0x2b   : > { %v242_v8 = vadd.f32 %v241_v7, %v240_v6  ;;  %v269_v28 = vld [vmem:[%s223_s27] sm:$0x7] }
  0x2d   : > { %243 = vadd.xlane.f32.xlu0 %v242_v8 }
  0x31   : > { %v248_v10 = vld.sshfl [vmem:[#allocation1] sm:$0xff pattern:$0x75316420]  ;;  %v249_v11 = vld.sshfl [vmem:[#allocation1 + $0x8] sm:$0xff pattern:$0x75316420] }
  0x32   : > { %v252_v12 = vsel %vm239_vm0, %v248_v10, 0.0  ;;  %v253_v13 = vsel %vm239_vm0, %v249_v11, 0.0  ;;  %259 = vst [vmem:[#allocation1] ss:$2 sm:$0xff] %v257_v9 }
  0x33   : > { %v254_v14 = vadd.f32 %v253_v13, %v252_v12 }
  0x35   : > { %255 = vadd.xlane.f32.xlu0 %v254_v14 }
  0x39   : > { %v260_v15 = vld.sshfl [vmem:[#allocation1] sm:$0xff pattern:$0x75316420]  ;;  %v261_v16 = vld.sshfl [vmem:[#allocation1 + $0x8] sm:$0xff pattern:$0x75316420] }
  0x3a   : > { %v264_v17 = vsel %vm239_vm0, %v260_v15, 0.0  ;;  %v265_v18 = vsel %vm239_vm0, %v261_v16, 0.0 }
  0x3b   : > { %v266_v19 = vadd.f32 %v265_v18, %v264_v17 }
  0x3d   : > { %267 = vadd.xlane.f32.xlu1 %v266_v19 }
  0xa0   : > { %v244_v21 = vpop.xlane.xlu0 %243 }
  0xa1   : > { %v273_v25 = vperm.slane %v244_v21, %v272_v23 }
  0xa8   : > { %v256_v24 = vpop.xlane.xlu0 %255 }
  0xa9   : > { %v276_v26 = vperm.slane %v256_v24, %v272_v23 }
  0xab   : > { %v282_v30 = vsel %vm281_vm2, %v273_v25, %v276_v26 }
  0xb0   : > { %v268_v27 = vpop.xlane.xlu1 %267 }
  0xb1   : > { %v279_v29 = vperm.slane %v268_v27, %v272_v23 }
  0xb3   : > { %v284_v31 = vsel %vm283_vm3, %v282_v30, %v279_v29 }
  0xb4   : > { %v285_v32 = vadd.f32 %v284_v31, %v269_v28 }
  0xb6   : > { %287 = vst.msk [vmem:[%s223_s27] sm:$0x7] %vm228_vm1, %v285_v32 }
  0xb7 PF: > { %s18_s14 = sadd.s32 1, %s583_s14   ;;  %s709_s9 = smov %s567_s10 }
  0xb8   : > { %p15_p0 = scmp.ge.s32.totalorder %s18_s14, 4   ;;  %s710_s10 = smov %s571_s11 }
  0xb9   : > { %s711_s11 = smov %s650_s21  ;;  %s712_s12 = smov %s579_s13 }
  0xba   : > { %s713_s13 = smov %s715_s16  ;;  %17 = sbr.rel (!%p15_p0) target bundleno = 6 (0x6), region = 85 }
  0xbf   :  { %307 = vsyncpa [#allocation3], 1 }
  0xc0   :  { %309 = vsyncpa [#allocation3 + $0x1], 1 }
  0xc1   :  { %310 = vsyncpa [#allocation5], 1 }
  0xc2   :  { %312 = vsyncpa [#allocation5 + $0x1], 1 }

</bundles_post_ra>
